<compile_context>
chip_gen: v5e
topology: v5e:2x2
jax: 0.10.0
libtpu: 0.0.40
codegen_flags: <defaults>
</compile_context>

<pallas_src>
import functools
import math

import jax
import jax.numpy as jnp
from jax.experimental import pallas as pl
from jax.experimental.pallas import tpu as pltpu

_LANES = 128
_SUBLANES = 8


def _round_up(n, m):
    return ((n + m - 1) // m) * m


def _pick_tile_rows(rows, row_width, itemsize, tile_rows):
    """Rows per grid step: ~2 MiB of input per tile, multiple of 8 sublanes."""
    if tile_rows is None:
        target_bytes = 2 * 1024 * 1024
        budget = max(_SUBLANES, target_bytes // max(1, row_width * itemsize))
        depth_cap = max(256, -(-rows // 16))   # keep >=~16 steps on large inputs
        tile_rows = min(budget, depth_cap, 4096)
    tm = min(tile_rows, _round_up(rows, _SUBLANES))
    return max(_SUBLANES, _round_up(tm, _SUBLANES))


def _vmem_limit_bytes(tm, row_width, itemsize):
    io = 2 * tm * row_width * itemsize * 2      # double-buffered input + output
    tmp = 6 * tm * row_width * 4                # f32 temporaries inside the kernel
    need = int(1.25 * (io + tmp)) + (2 << 20)
    # 32 MiB floor is safe on every generation (v5e/v6e: 128 MiB, v7x: 64 MiB phys.)
    return max(need, 32 * 1024 * 1024)


def _ln_packed_kernel(x_ref, s_ref, w_ref, b_ref, o_ref, *, eps):
    # x_ref: (tm, 128) lane-dense tile; each row holds G = 128 // C original rows.
    # s_ref: (128, 128) block-diagonal averaging matrix (1/C within each group).
    x = x_ref[...].astype(jnp.float32)
    s = s_ref[...]
    mu = jnp.dot(x, s, precision=jax.lax.Precision.HIGHEST,
                 preferred_element_type=jnp.float32)        # per-group mean, broadcast
    xc = x - mu
    var = jnp.dot(xc * xc, s, precision=jax.lax.Precision.HIGHEST,
                  preferred_element_type=jnp.float32)        # per-group E[(x-mu)^2]
    y = xc * jax.lax.rsqrt(var + eps) * w_ref[...] + b_ref[...]
    o_ref[...] = y.astype(o_ref.dtype)


def _ln_rows_kernel(x_ref, w_ref, b_ref, o_ref, *, eps):
    # x_ref: (tm, C) tile of independent rows; normalize each row over C.
    x = x_ref[...].astype(jnp.float32)
    mu = jnp.mean(x, axis=-1, keepdims=True)
    xc = x - mu
    var = jnp.mean(xc * xc, axis=-1, keepdims=True)          # unbiased=False
    y = xc * jax.lax.rsqrt(var + eps) * w_ref[...] + b_ref[...]
    o_ref[...] = y.astype(o_ref.dtype)


def withbias_layernorm(x, weight, bias, *, eps=1e-5, tile_rows=None):
    """LayerNorm over the last dim: (x - mean)/sqrt(var + eps) * weight + bias."""
    orig_shape = x.shape
    C = orig_shape[-1]
    rows = math.prod(orig_shape[:-1]) if len(orig_shape) > 1 else 1
    itemsize = jnp.dtype(x.dtype).itemsize
    x2 = x.reshape(rows, C)

    g = _LANES // C if (0 < C < _LANES and _LANES % C == 0) else 1
    if g > 1 and rows % g == 0:
        # ---- lane-dense packed path: fold G rows into the 128-lane dim ----
        width = g * C                                         # == 128
        prows = rows // g
        xp = x2.reshape(prows, width)
        tm = _pick_tile_rows(prows, width, itemsize, tile_rows)

        gids = jnp.arange(width) // C
        s = (gids[:, None] == gids[None, :]).astype(jnp.float32) / float(C)
        w2 = jnp.tile(weight.astype(jnp.float32), g).reshape(1, width)
        b2 = jnp.tile(bias.astype(jnp.float32), g).reshape(1, width)

        out = pl.pallas_call(
            functools.partial(_ln_packed_kernel, eps=eps),
            out_shape=jax.ShapeDtypeStruct((prows, width), x.dtype),
            grid_spec=pltpu.PrefetchScalarGridSpec(
                num_scalar_prefetch=0,
                grid=(pl.cdiv(prows, tm),),
                in_specs=[
                    pl.BlockSpec((tm, width), lambda i: (i, 0)),
                    pl.BlockSpec((width, width), lambda i: (0, 0)),
                    pl.BlockSpec((1, width), lambda i: (0, 0)),
                    pl.BlockSpec((1, width), lambda i: (0, 0)),
                ],
                out_specs=pl.BlockSpec((tm, width), lambda i: (i, 0)),
            ),
            compiler_params=pltpu.CompilerParams(
                dimension_semantics=("parallel",),
                vmem_limit_bytes=_vmem_limit_bytes(tm, width, itemsize),
            ),
        )(xp, s, w2, b2)
        return out.reshape(orig_shape)

    # ---- general path: one row per normalization group, ragged last block ----
    tm = _pick_tile_rows(rows, C, itemsize, tile_rows)
    w2 = weight.astype(jnp.float32).reshape(1, C)
    b2 = bias.astype(jnp.float32).reshape(1, C)

    out = pl.pallas_call(
        functools.partial(_ln_rows_kernel, eps=eps),
        out_shape=jax.ShapeDtypeStruct((rows, C), x.dtype),
        grid_spec=pltpu.PrefetchScalarGridSpec(
            num_scalar_prefetch=0,
            grid=(pl.cdiv(rows, tm),),
            in_specs=[
                pl.BlockSpec((tm, C), lambda i: (i, 0)),
                pl.BlockSpec((1, C), lambda i: (0, 0)),
                pl.BlockSpec((1, C), lambda i: (0, 0)),
            ],
            out_specs=pl.BlockSpec((tm, C), lambda i: (i, 0)),
        ),
        compiler_params=pltpu.CompilerParams(
            dimension_semantics=("parallel",),
            vmem_limit_bytes=_vmem_limit_bytes(tm, C, itemsize),
        ),
    )(x2, w2, b2)
    return out.reshape(orig_shape)


if __name__ == "__main__":
    key = jax.random.PRNGKey(0)
    k0, k1 = jax.random.split(key)

    def reference(x, w, b, eps=1e-5):
        mu = jnp.mean(x, axis=-1, keepdims=True)
        var = jnp.mean((x - mu) ** 2, axis=-1, keepdims=True)
        return (x - mu) / jnp.sqrt(var + eps) * w + b

    # Primary test: channel-last (B, N, C) with C=32 (< 128 -> lane-dense packed path).
    B, N, C = 2, 64, 32
    x = jax.random.normal(k0, (B, N, C), dtype=jnp.float32)
    weight = jnp.ones((C,), jnp.float32) + 0.01 * jnp.arange(C, dtype=jnp.float32)
    bias = jnp.zeros((C,), jnp.float32) + 0.001 * jnp.arange(C, dtype=jnp.float32)

    out = jax.block_until_ready(withbias_layernorm(x, weight, bias))
    assert out.shape == x.shape and out.dtype == x.dtype
    assert jnp.allclose(out, reference(x, weight, bias), atol=1e-5, rtol=1e-5)

    # Secondary test: C that does not divide 128 and a ragged row count
    # (exercises the general path with a masked final block, no host padding).
    B2, N2, C2 = 2, 37, 96
    x_b = jax.random.normal(k1, (B2, N2, C2), dtype=jnp.float32)
    w_b = jnp.ones((C2,), jnp.float32) - 0.005 * jnp.arange(C2, dtype=jnp.float32)
    b_b = 0.002 * jnp.arange(C2, dtype=jnp.float32)

    out_b = jax.block_until_ready(withbias_layernorm(x_b, w_b, b_b))
    assert jnp.allclose(out_b, reference(x_b, w_b, b_b), atol=1e-5, rtol=1e-5)

    print("KERNEL_OK")
</pallas_src>

<mosaic_0001>
module attributes {stable_mosaic.version = 11 : i64} {
  func.func @_ln_packed_kernel(%arg0: i32, %arg1: memref<32x128xf32, #tpu.memory_space<vmem>>, %arg2: memref<128x128xf32, #tpu.memory_space<vmem>>, %arg3: memref<1x128xf32, #tpu.memory_space<vmem>>, %arg4: memref<1x128xf32, #tpu.memory_space<vmem>>, %arg5: memref<32x128xf32, #tpu.memory_space<vmem>>) attributes {dimension_semantics = [#tpu.dimension_semantics<parallel>], iteration_bounds = array<i64: 1>, scalar_prefetch = 0 : i64, scratch_operands = 0 : i64, tpu.core_type = #tpu.core_type<tc>, window_params = [{transform_indices = @transform_0, window_bounds = array<i64: 32, 128>}, {pipeline_mode = #tpu.pipeline_mode<synchronous>, transform_indices = @transform_1, window_bounds = array<i64: 128, 128>}, {pipeline_mode = #tpu.pipeline_mode<synchronous>, transform_indices = @transform_2, window_bounds = array<i64: 1, 128>}, {pipeline_mode = #tpu.pipeline_mode<synchronous>, transform_indices = @transform_3, window_bounds = array<i64: 1, 128>}, {transform_indices = @transform_4, window_bounds = array<i64: 32, 128>}]} {
    %c0 = arith.constant 0 : index
    %c0_0 = arith.constant 0 : index
    %0 = vector.load %arg1[%c0, %c0_0] : memref<32x128xf32, #tpu.memory_space<vmem>>, vector<32x128xf32>
    %c0_1 = arith.constant 0 : index
    %c0_2 = arith.constant 0 : index
    %1 = vector.load %arg2[%c0_1, %c0_2] : memref<128x128xf32, #tpu.memory_space<vmem>>, vector<128x128xf32>
    %cst = arith.constant dense<0.000000e+00> : vector<32x128xf32>
    %2 = tpu.matmul %0, %1, %cst {dimension_numbers = #tpu.dot_dimension_numbers<[1], [0], [0], [1], [0, 0, 1, 1], [], []>, precision = #tpu.contract_precision<fp32>} : vector<32x128xf32>, vector<128x128xf32>, vector<32x128xf32> -> vector<32x128xf32>
    %3 = arith.subf %0, %2 : vector<32x128xf32>
    %4 = arith.mulf %3, %3 : vector<32x128xf32>
    %cst_3 = arith.constant dense<0.000000e+00> : vector<32x128xf32>
    %5 = tpu.matmul %4, %1, %cst_3 {dimension_numbers = #tpu.dot_dimension_numbers<[1], [0], [0], [1], [0, 0, 1, 1], [], []>, precision = #tpu.contract_precision<fp32>} : vector<32x128xf32>, vector<128x128xf32>, vector<32x128xf32> -> vector<32x128xf32>
    %cst_4 = arith.constant 9.99999974E-6 : f32
    %6 = vector.broadcast %cst_4 : f32 to vector<32x128xf32>
    %7 = arith.addf %5, %6 : vector<32x128xf32>
    %8 = math.rsqrt %7 : vector<32x128xf32>
    %9 = arith.mulf %3, %8 : vector<32x128xf32>
    %c0_5 = arith.constant 0 : index
    %c0_6 = arith.constant 0 : index
    %10 = vector.load %arg3[%c0_5, %c0_6] : memref<1x128xf32, #tpu.memory_space<vmem>>, vector<1x128xf32>
    %11 = vector.broadcast %10 : vector<1x128xf32> to vector<32x128xf32>
    %12 = arith.mulf %9, %11 : vector<32x128xf32>
    %c0_7 = arith.constant 0 : index
    %c0_8 = arith.constant 0 : index
    %13 = vector.load %arg4[%c0_7, %c0_8] : memref<1x128xf32, #tpu.memory_space<vmem>>, vector<1x128xf32>
    %14 = vector.broadcast %13 : vector<1x128xf32> to vector<32x128xf32>
    %15 = arith.addf %12, %14 : vector<32x128xf32>
    %c0_9 = arith.constant 0 : index
    %c0_10 = arith.constant 0 : index
    %16 = vector.load %arg5[%c0_9, %c0_10] : memref<32x128xf32, #tpu.memory_space<vmem>>, vector<32x128xf32>
    tpu.vector_store %arg5[%c0_9, %c0_10], %15 {strides = array<i32>} : memref<32x128xf32, #tpu.memory_space<vmem>>, vector<32x128xf32>,
    return
  }
  func.func @transform_0(%arg0: i32) -> (i32, i32) {
    %c0_i32 = arith.constant 0 : i32
    %c0_i32_0 = arith.constant 0 : i32
    return %arg0, %c0_i32 : i32, i32
  }
  func.func @transform_1(%arg0: i32) -> (i32, i32) {
    %c0_i32 = arith.constant 0 : i32
    %c0_i32_0 = arith.constant 0 : i32
    %c0_i32_1 = arith.constant 0 : i32
    return %c0_i32, %c0_i32_0 : i32, i32
  }
  func.func @transform_2(%arg0: i32) -> (i32, i32) {
    %c0_i32 = arith.constant 0 : i32
    %c0_i32_0 = arith.constant 0 : i32
    %c0_i32_1 = arith.constant 0 : i32
    return %c0_i32, %c0_i32_0 : i32, i32
  }
  func.func @transform_3(%arg0: i32) -> (i32, i32) {
    %c0_i32 = arith.constant 0 : i32
    %c0_i32_0 = arith.constant 0 : i32
    %c0_i32_1 = arith.constant 0 : i32
    return %c0_i32, %c0_i32_0 : i32, i32
  }
  func.func @transform_4(%arg0: i32) -> (i32, i32) {
    %c0_i32 = arith.constant 0 : i32
    %c0_i32_0 = arith.constant 0 : i32
    return %arg0, %c0_i32 : i32, i32
  }
}

</mosaic_0001>

<bundles_post_ra>
// kernel: tpu_custom_call.1
= control target key start
LH: loop header
LB: loop body
LE: loop exit
PB: predicated region body
PF: predicated region fallthrough
CT: control target
= control target key end

     0   :  { %9 = vsyncpa [#allocation3], 0  ;;  %s1635_s0 = inlined_call_operand.hbm [shape: f32[32,128], index: 0, kind: input, shape index: {}]   ;;  %s1636_s1 = inlined_call_operand.hbm [shape: f32[128,128], index: 1, kind: input, shape index: {}]   ;;  %s1637_s2 = inlined_call_operand.vmem [shape: f32[1,128], index: 2, kind: input, shape index: {}]   ;;  %s1638_s3 = inlined_call_operand.vmem [shape: f32[1,128], index: 3, kind: input, shape index: {}]   ;;  %s1639_s4 = inlined_call_operand.hbm [shape: f32[32,128], index: 4, kind: output, shape index: {}]  }
   0x1   :  { %10 = vsyncpa [#allocation6], 0 }
   0x2   :  { %11 = vsyncpa [#allocation4], 0  ;;  %s16_s17 = sshll.u32 %s1635_s0, 4  ;;  %s1123_s18 = smov [#allocation2]   ;;  %s17_s17 = int_to_ptr.hbm [resolvable:$true] %s16_s17 }
   0x3   :  { %s18_s19 = sshll.u32 %s1123_s18, 4  ;;  %s29_s22 = sshll.u32 %s1636_s1, 4  ;;  %s19_s19 = int_to_ptr.vmem [resolvable:$true] %s18_s19  ;;  %s30_s22 = int_to_ptr.hbm [resolvable:$true] %s29_s22 }
   0x4   :  { %s1124_s23 = smov 128   ;;  %s1125_s24 = smov 8  }
   0x5   :  { %24 = dma.hbm_to_vmem [thread:$0]  %s17_s17, 512, %s19_s19, [#allocation3], %s1124_s23, %s1124_s23, %s1125_s24  }
   0x6   :  { %s1126_s25 = smov [#allocation5]  }
   0x7   :  { %s31_s26 = sshll.u32 %s1126_s25, 4  ;;  %s32_s26 = int_to_ptr.vmem [resolvable:$true] %s31_s26 }
   0x8   :  { %37 = dma.hbm_to_vmem [thread:$0]  %s30_s22, 2048, %s32_s26, [#allocation6], %s1124_s23, %s1124_s23, %s1125_s24  }
   0x9   :  { %1117 = dma.done.wait [#allocation3], 512  }
   0xa   :  { %1118 = vsyncadd [#allocation3], 4294966784 }
   0xb   :  { %1119 = dma.done.wait [#allocation6], 2048  }
   0xc   :  { %1120 = vsyncadd [#allocation6], 4294965248  ;;  %v69_v0 = vld [vmem:[#allocation5 + $0x78] sm:$0xff]  ;;  %v68_v1 = vld [vmem:[#allocation5 + $0x70] sm:$0xff]  ;;  %s1016_s5 = sshll.u32 %s1639_s4, 4  ;;  %s1017_s5 = int_to_ptr.hbm [resolvable:$true] %s1016_s5 }
   0xd   :  { %v67_v2 = vld [vmem:[#allocation5 + $0x68] sm:$0xff]  ;;  %v1165_v3 = vand.u32 4294901760, %v69_v0  ;;  %v1167_v4 = vand.u32 4294901760, %v68_v1  ;;  %v66_v6 = vld [vmem:[#allocation5 + $0x60] sm:$0xff]  ;;  %v65_v7 = vld [vmem:[#allocation5 + $0x58] sm:$0xff] }
   0xe   :  { %v1169_v5 = vand.u32 4294901760, %v67_v2  ;;  %v64_v8 = vld [vmem:[#allocation5 + $0x50] sm:$0xff]  ;;  %v1171_v9 = vand.u32 4294901760, %v66_v6  ;;  %v1173_v10 = vand.u32 4294901760, %v65_v7  ;;  %v63_v12 = vld [vmem:[#allocation5 + $0x48] sm:$0xff]  ;;  %v62_v13 = vld [vmem:[#allocation5 + $0x40] sm:$0xff] }
   0xf   :  { %v1175_v11 = vand.u32 4294901760, %v64_v8  ;;  %71 = vmatpush.msra.mxu0 %v1165_v3  ;;  %v1179_v14 = vsub.f32 %v69_v0, %v1165_v3  ;;  %v1182_v15 = vsub.f32 %v68_v1, %v1167_v4  ;;  %318 = vmatpush.msra.mxu3 %v1165_v3  ;;  %v1188_v17 = vand.u32 4294901760, %v63_v12  ;;  %v61_v18 = vld [vmem:[#allocation5 + $0x38] sm:$0xff]  ;;  %v60_v29 = vld [vmem:[#allocation5 + $0x30] sm:$0xff]  ;;  %v59_v36 = vld [vmem:[#allocation5 + $0x28] sm:$0xff] }
  0x10   :  { %v1186_v16 = vsub.f32 %v67_v2, %v1169_v5  ;;  %v1191_v19 = vsub.f32 %v66_v6, %v1171_v9  ;;  %v1194_v20 = vsub.f32 %v65_v7, %v1173_v10  ;;  %v1196_v21 = vand.u32 4294901760, %v62_v13  ;;  %v58_v43 = vld [vmem:[#allocation5 + $0x20] sm:$0xff]  ;;  %v57_v49 = vld [vmem:[#allocation5 + $0x18] sm:$0xff]  ;;  %v56_v55 = vld [vmem:[#allocation5 + $0x10] sm:$0xff] }
  0x11   :  { %v1199_v22 = vsub.f32 %v64_v8, %v1175_v11  ;;  %73 = vmatpush.msra.mxu0 %v1167_v4  ;;  %250 = vmatpush.msra.mxu2 %v1179_v14  ;;  %v1204_v23 = vand.u32 4294901760, %v1179_v14  ;;  %v1207_v24 = vand.u32 4294901760, %v1182_v15  ;;  %v1216_v27 = vand.u32 4294901760, %v61_v18  ;;  %v1287_v56 = vld [vmem:[#allocation2] sm:$0xff]  ;;  %v55_v62 = vld [vmem:[#allocation5 + $0x8] sm:$0xff] }
  0x12   :  { %1657 = vst [vmem:[#allocation11_spill] sm:$0xff] %v1191_v19  ;;  %v1210_v25 = vand.u32 4294901760, %v1186_v16  ;;  %320 = vmatpush.msra.mxu3 %v1167_v4  ;;  %v1214_v26 = vand.u32 4294901760, %v1191_v19  ;;  %v1219_v28 = vsub.f32 %v63_v12, %v1188_v17  ;;  %v1230_v33 = vand.u32 4294901760, %v1194_v20  ;;  %v54_v8 = vld [vmem:[#allocation5] sm:$0xff] }
  0x13   :  { %1658 = vst [vmem:[#allocation12_spill] sm:$0xff] %v1194_v20  ;;  %75 = vmatpush.msra.mxu0 %v1169_v5  ;;  %253 = vmatpush.msra.mxu2 %v1182_v15  ;;  %v138_v30 = vsub.f32 %v1179_v14, %v1204_v23  ;;  %v144_v31 = vsub.f32 %v1182_v15, %v1207_v24  ;;  %v1234_v34 = vand.u32 4294901760, %v1199_v22  ;;  %v1247_v40 = vand.u32 4294901760, %v60_v29 }
  0x14   :  { %1659 = vst [vmem:[#allocation13_spill] sm:$0xff] %v1199_v22  ;;  %v150_v32 = vsub.f32 %v1186_v16, %v1210_v25  ;;  %322 = vmatpush.msra.mxu3 %v1169_v5  ;;  %v1237_v35 = vsub.f32 %v62_v13, %v1196_v21  ;;  %v156_v39 = vsub.f32 %v1191_v19, %v1214_v26  ;;  %v1251_v41 = vand.u32 4294901760, %v1219_v28 }
  0x15   :  { %1660 = vst [vmem:[#allocation14_spill] sm:$0xff] %v1219_v28  ;;  %77 = vmatpush.msra.mxu0 %v1171_v9  ;;  %v1240_v37 = vand.u32 4294901760, %v138_v30  ;;  %256 = vmatpush.msra.mxu2 %v1186_v16  ;;  %v1243_v38 = vand.u32 4294901760, %v144_v31  ;;  %v1254_v42 = vsub.f32 %v61_v18, %v1216_v27  ;;  %v162_v45 = vsub.f32 %v1194_v20, %v1230_v33  ;;  %v1337_v30 = vld [vmem:[#allocation2 + $0x8] sm:$0xff] }
  0x16   :  { %1661 = vst [vmem:[#allocation15_spill] sm:$0xff] %v1237_v35  ;;  %324 = vmatpush.msra.mxu3 %v1171_v9  ;;  %v1258_v44 = vand.u32 4294901760, %v150_v32  ;;  %v1262_v46 = vand.u32 4294901760, %v59_v36  ;;  %v168_v47 = vsub.f32 %v1199_v22, %v1234_v34  ;;  %v1269_v48 = vand.u32 4294901760, %v1237_v35 }
  0x17   :  { %1662 = vst [vmem:[#allocation16_spill] sm:$0xff] %v1254_v42  ;;  %79 = vmatpush.msra.mxu0 %v1173_v10  ;;  %140 = vmatpush.msra.mxu1 %v1240_v37  ;;  %v1273_v50 = vand.u32 4294901760, %v156_v39  ;;  %v1275_v51 = vand.u32 4294901760, %v58_v43  ;;  %v1278_v52 = vsub.f32 %v60_v29, %v1247_v40  ;;  %v174_v53 = vsub.f32 %v1219_v28, %v1251_v41 }
  0x18   :  { %259 = vmatpush.msra.mxu2 %v1191_v19  ;;  %326 = vmatpush.msra.mxu3 %v1173_v10  ;;  %v1285_v54 = vand.u32 4294901760, %v1254_v42  ;;  %1664 = vst [vmem:[#allocation18_spill] sm:$0xff] %v1287_v56  ;;  %v1291_v57 = vand.u32 4294901760, %v162_v45  ;;  %v1293_v58 = vand.u32 4294901760, %v57_v49  ;;  %v1296_v59 = vsub.f32 %v59_v36, %v1262_v46 }
  0x19   :  { %81 = vmatpush.msra.mxu0 %v1175_v11  ;;  %146 = vmatpush.msra.mxu1 %v1243_v38  ;;  %1663 = vst [vmem:[#allocation17_spill] sm:$0xff] %v1278_v52  ;;  %v1299_v60 = vand.u32 4294901760, %v168_v47  ;;  %v180_v61 = vsub.f32 %v1237_v35, %v1269_v48  ;;  %v1306_v63 = vand.u32 4294901760, %v56_v55  ;;  %v1309_v0 = vand.u32 4294901760, %v1278_v52 }
  0x1a   :  { %262 = vmatpush.msra.mxu2 %v1194_v20  ;;  %328 = vmatpush.msra.mxu3 %v1175_v11  ;;  %1665 = vst [vmem:[#allocation19_spill] sm:$0xff] %v1296_v59  ;;  %v1312_v1 = vsub.f32 %v58_v43, %v1275_v51  ;;  %v1315_v2 = vand.u32 4294901760, %v1287_v56  ;;  %v1318_v6 = vand.u32 4294901760, %v174_v53  ;;  %v186_v7 = vsub.f32 %v1254_v42, %v1285_v54 }
  0x1b   :  { %83 = vmatpush.msra.mxu0 %v1188_v17  ;;  %152 = vmatpush.msra.mxu1 %v1258_v44  ;;  %v1325_v12 = vand.u32 4294901760, %v55_v62  ;;  %v1328_v13 = vand.u32 4294901760, %v1296_v59  ;;  %v1331_v18 = vsub.f32 %v57_v49, %v1293_v58  ;;  %1668 = vst [vmem:[#allocation22_spill] sm:$0xff] %v1337_v30  ;;  %v1340_v31 = vand.u32 4294901760, %v180_v61 }
  0x1c   :  { %265 = vmatpush.msra.mxu2 %v1199_v22  ;;  %330 = vmatpush.msra.mxu3 %v1188_v17  ;;  %1666 = vst [vmem:[#allocation20_spill] sm:$0xff] %v1312_v1  ;;  %v1335_v29 = vsub.f32 %v1287_v56, %v1315_v2  ;;  %v192_v32 = vsub.f32 %v1278_v52, %v1309_v0  ;;  %v1347_v36 = vand.u32 4294901760, %v54_v8  ;;  %v1350_v39 = vand.u32 4294901760, %v1312_v1 }
  0x1d   :  { %85 = vmatpush.msra.mxu0 %v1196_v21  ;;  %158 = vmatpush.msra.mxu1 %v1273_v50  ;;  %1667 = vst [vmem:[#allocation21_spill] sm:$0xff] %v1331_v18  ;;  %v1353_v43 = vsub.f32 %v56_v55, %v1306_v63  ;;  %v1359_v47 = vand.u32 4294901760, %v1337_v30  ;;  %v1363_v49 = vand.u32 4294901760, %v186_v7  ;;  %v198_v53 = vsub.f32 %v1296_v59, %v1328_v13 }
  0x1e   :  { %268 = vmatpush.msra.mxu2 %v1219_v28  ;;  %332 = vmatpush.msra.mxu3 %v1196_v21  ;;  %v104_v45 = vand.u32 4294901760, %v1335_v29  ;;  %v1368_v55 = vand.u32 4294901760, %v1331_v18  ;;  %v1371_v61 = vsub.f32 %v55_v62, %v1325_v12  ;;  %v1377_v56 = vand.u32 4294901760, %v192_v32 }
  0x1f   :  { %87 = vmatpush.msra.mxu0 %v1216_v27  ;;  %164 = vmatpush.msra.mxu1 %v1291_v57  ;;  %1669 = vst [vmem:[#allocation23_spill] sm:$0xff] %v1353_v43  ;;  %v204_v7 = vsub.f32 %v1312_v1, %v1350_v39  ;;  %v1396_v32 = vand.u32 4294901760, %v198_v53 }
  0x20   :  { %271 = vmatpush.msra.mxu2 %v1237_v35  ;;  %334 = vmatpush.msra.mxu3 %v1216_v27  ;;  %1670 = vst [vmem:[#allocation24_spill] sm:$0xff] %v1377_v56  ;;  %v1385_v35 = vsub.f32 %v54_v8, %v1347_v36  ;;  %v105_v62 = vsub.f32 %v1335_v29, %v104_v45  ;;  %v1401_v28 = vand.u32 4294901760, %v1371_v61 }
  0x21   :  { %89 = vmatpush.msra.mxu0 %v1247_v40  ;;  %170 = vmatpush.msra.mxu1 %v1299_v60  ;;  %1671 = vst [vmem:[#allocation25_spill] sm:$0xff] %v1396_v32  ;;  %v210_v8 = vsub.f32 %v1331_v18, %v1368_v55 }
  0x22   :  { %274 = vmatpush.msra.mxu2 %v1254_v42  ;;  %336 = vmatpush.msra.mxu3 %v1247_v40  ;;  %v1382_v42 = vand.u32 4294901760, %v1353_v43  ;;  %v1414_v22 = vand.u32 4294901760, %v1385_v35  ;;  %v106_v20 = vand.u32 4294901760, %v105_v62 }
  0x23   :  { %91 = vmatpush.msra.mxu0 %v1262_v46  ;;  %176 = vmatpush.msra.mxu1 %v1318_v6 }
  0x24   :  { %277 = vmatpush.msra.mxu2 %v1278_v52  ;;  %338 = vmatpush.msra.mxu3 %v1262_v46  ;;  %v1392_v52 = vsub.f32 %v1337_v30, %v1359_v47  ;;  %v1409_v30 = vand.u32 4294901760, %v204_v7  ;;  %v216_v53 = vsub.f32 %v1353_v43, %v1382_v42  ;;  %v1424_v7 = vand.u32 4294901760, %v210_v8 }
  0x25   :  { %93 = vmatpush.msra.mxu0 %v1275_v51  ;;  %182 = vmatpush.msra.mxu1 %v1340_v31 }
  0x26   :  { %280 = vmatpush.msra.mxu2 %v1296_v59  ;;  %340 = vmatpush.msra.mxu3 %v1275_v51  ;;  %v1403_v59 = vld [vmem:[#allocation2 + $0x10] sm:$0xff]  ;;  %1673 = vst [vmem:[#allocation27_spill] sm:$0xff] %v1409_v30  ;;  %v1432_v62 = vand.u32 4294901760, %v216_v53 }
  0x27   :  { %95 = vmatpush.msra.mxu0 %v1293_v58  ;;  %188 = vmatpush.msra.mxu1 %v1363_v49  ;;  %1672 = vst [vmem:[#allocation26_spill] sm:$0xff] %v1403_v59  ;;  %v1420_v19 = vand.u32 4294901760, %v1403_v59 }
  0x28   :  { %283 = vmatpush.msra.mxu2 %v1312_v1  ;;  %342 = vmatpush.msra.mxu3 %v1293_v58  ;;  %v112_v1 = vand.u32 4294901760, %v1392_v52 }
  0x29   :  { %97 = vmatpush.msra.mxu0 %v1306_v63  ;;  %194 = vmatpush.msra.mxu1 %v1377_v56  ;;  %v222_v56 = vsub.f32 %v1371_v61, %v1401_v28 }
  0x2a   :  { %286 = vmatpush.msra.mxu2 %v1331_v18  ;;  %344 = vmatpush.msra.mxu3 %v1306_v63  ;;  %v228_v18 = vsub.f32 %v1385_v35, %v1414_v22  ;;  %v113_v8 = vsub.f32 %v1392_v52, %v112_v1 }
  0x2b   :  { %99 = vmatpush.msra.mxu0 %v1325_v12  ;;  %200 = vmatpush.msra.mxu1 %v1396_v32  ;;  %v119_v32 = vsub.f32 %v1403_v59, %v1420_v19 }
  0x2c   :  { %289 = vmatpush.msra.mxu2 %v1353_v43  ;;  %346 = vmatpush.msra.mxu3 %v1325_v12  ;;  %v1442_v43 = vand.u32 4294901760, %v222_v56  ;;  %v114_v53 = vand.u32 4294901760, %v113_v8 }
  0x2d   :  { %101 = vmatpush.msra.mxu0 %v1347_v36  ;;  %206 = vmatpush.msra.mxu1 %v1409_v30  ;;  %v1444_v30 = vld [vmem:[#allocation2 + $0x18] sm:$0xff]  ;;  %v120_v59 = vand.u32 4294901760, %v119_v32 }
  0x2e   :  { %107 = vmatmul.f32.vlgmr.msra.gmra.mxu0 %v106_v20  ;;  %292 = vmatpush.msra.mxu2 %v1371_v61  ;;  %v1450_v20 = vand.u32 4294901760, %v228_v18  ;;  %v1454_v56 = vand.u32 4294901760, %v1444_v30 }
  0x2f   :  { %212 = vmatpush.msra.mxu1 %v1424_v7  ;;  %377 = vmatpush.msrb.mxu0 %v1204_v23  ;;  %v121_v18 = vsub.f32 %v119_v32, %v120_v59 }
  0x30   :  { %295 = vmatpush.msra.mxu2 %v1385_v35  ;;  %348 = vmatpush.msra.mxu3 %v1347_v36 }
  0x31   :  { %218 = vmatpush.msra.mxu1 %v1432_v62  ;;  %381 = vmatpush.msrb.mxu0 %v1207_v24 }
  0x32   :  { %298 = vmatmul.f32.vlgmr.msra.gmra.mxu2 %v1335_v29  ;;  %352 = vmatmul.f32.vlgmr.msra.gmra.mxu3 %v104_v45  ;;  %v127_v29 = vsub.f32 %v1444_v30, %v1454_v56 }
  0x33   :  { %224 = vmatpush.msra.mxu1 %v1442_v43  ;;  %385 = vmatpush.msrb.mxu0 %v1210_v25 }
  0x34   :  { %582 = vmatpush.msrb.mxu3 %v1240_v37  ;;  %513 = vmatpush.msrb.mxu2 %v1165_v3  ;;  %v122_v37 = vand.u32 4294901760, %v121_v18  ;;  %v128_v45 = vand.u32 4294901760, %v127_v29 }
  0x35   :  { %230 = vmatpush.msra.mxu1 %v1450_v20  ;;  %389 = vmatpush.msrb.mxu0 %v1214_v26 }
  0x36   :  { %115 = vmatmul.f32.gmra.mxu0 %v114_v53  ;;  %232 = vmatmul.f32.vlgmr.msra.gmra.mxu1 %v1315_v2 }
  0x37   :  { %456 = vmatpush.msrb.mxu1 %v1165_v3  ;;  %393 = vmatpush.msrb.mxu0 %v1230_v33 }
  0x38   :  { %588 = vmatpush.msrb.mxu3 %v1243_v38  ;;  %515 = vmatpush.msrb.mxu2 %v1167_v4  ;;  %v129_v38 = vsub.f32 %v127_v29, %v128_v45 }
  0x39   :  { %458 = vmatpush.msrb.mxu1 %v1167_v4  ;;  %397 = vmatpush.msrb.mxu0 %v1234_v34 }
  0x3a   :  { %303 = vmatmul.f32.gmra.mxu2 %v1392_v52  ;;  %358 = vmatmul.f32.gmra.mxu3 %v112_v1  ;;  %v1677_v52 = vld [vmem:[#allocation25_spill] sm:$0xff]  ;;  %v1682_v1 = vld [vmem:[#allocation16_spill] sm:$0xff] }
  0x3b   :  { %460 = vmatpush.msrb.mxu1 %v1169_v5  ;;  %401 = vmatpush.msrb.mxu0 %v1251_v41 }
  0x3c   :  { %594 = vmatpush.msrb.mxu3 %v1258_v44  ;;  %517 = vmatpush.msrb.mxu2 %v1169_v5  ;;  %v130_v44 = vand.u32 4294901760, %v129_v38 }
  0x3d   :  { %462 = vmatpush.msrb.mxu1 %v1171_v9  ;;  %405 = vmatpush.msrb.mxu0 %v1269_v48 }
  0x3e   :  { %123 = vmatmul.f32.gmra.mxu0 %v122_v37  ;;  %236 = vmatmul.f32.gmra.mxu1 %v1359_v47 }
  0x3f   :  { %464 = vmatpush.msrb.mxu1 %v1173_v10  ;;  %409 = vmatpush.msrb.mxu0 %v1285_v54 }
  0x40   :  { %600 = vmatpush.msrb.mxu3 %v1273_v50  ;;  %519 = vmatpush.msrb.mxu2 %v1171_v9  ;;  %v1674_v50 = vld [vmem:[#allocation24_spill] sm:$0xff] }
  0x41   :  { %466 = vmatpush.msrb.mxu1 %v1175_v11  ;;  %413 = vmatpush.msrb.mxu0 %v1309_v0 }
  0x42   :  { %308 = vmatmul.f32.gmra.mxu2 %v119_v32  ;;  %364 = vmatmul.f32.gmra.mxu3 %v120_v59  ;;  %v1680_v59 = vld [vmem:[#allocation14_spill] sm:$0xff] }
  0x43   :  { %468 = vmatpush.msrb.mxu1 %v1188_v17  ;;  %417 = vmatpush.msrb.mxu0 %v1328_v13  ;;  %v1689_v32 = vld [vmem:[#allocation22_spill] sm:$0xff] }
  0x44   :  { %606 = vmatpush.msrb.mxu3 %v1291_v57  ;;  %521 = vmatpush.msrb.mxu2 %v1173_v10  ;;  %v1679_v57 = vld [vmem:[#allocation27_spill] sm:$0xff] }
  0x45   :  { %470 = vmatpush.msrb.mxu1 %v1196_v21  ;;  %421 = vmatpush.msrb.mxu0 %v1350_v39 }
  0x46   :  { %131 = vmatmul.f32.gmra.mxu0 %v130_v44  ;;  %240 = vmatmul.f32.gmra.mxu1 %v1420_v19 }
  0x47   :  { %472 = vmatpush.msrb.mxu1 %v1216_v27  ;;  %425 = vmatpush.msrb.mxu0 %v1368_v55 }
  0x48   :  { %612 = vmatpush.msrb.mxu3 %v1299_v60  ;;  %523 = vmatpush.msrb.mxu2 %v1175_v11  ;;  %v1681_v60 = vld [vmem:[#allocation15_spill] sm:$0xff] }
  0x49   :  { %474 = vmatpush.msrb.mxu1 %v1247_v40  ;;  %429 = vmatpush.msrb.mxu0 %v1382_v42 }
  0x4a   :  { %313 = vmatmul.f32.gmra.mxu2 %v127_v29  ;;  %370 = vmatmul.f32.gmra.mxu3 %v128_v45 }
  0x4b   :  { %476 = vmatpush.msrb.mxu1 %v1262_v46  ;;  %433 = vmatpush.msrb.mxu0 %v1401_v28 }
  0x4c   :  { %618 = vmatpush.msrb.mxu3 %v1318_v6  ;;  %525 = vmatpush.msrb.mxu2 %v1188_v17  ;;  %v1684_v6 = vld [vmem:[#allocation19_spill] sm:$0xff] }
  0x4d   :  { %478 = vmatpush.msrb.mxu1 %v1275_v51  ;;  %437 = vmatpush.msrb.mxu0 %v1414_v22 }
  0x4e   :  { %244 = vmatmul.f32.gmra.mxu1 %v1454_v56  ;;  %439 = vmatmul.f32.vlgmr.msrb.gmra.mxu0 %v1315_v2 }
  0x4f   :  { %480 = vmatpush.msrb.mxu1 %v1293_v58  ;;  %692 = vmatpush.msra.mxu0 %v1179_v14  ;;  %v1675_v14 = vld [vmem:[#allocation11_spill] sm:$0xff] }
  0x50   :  { %624 = vmatpush.msrb.mxu3 %v1340_v31  ;;  %527 = vmatpush.msrb.mxu2 %v1196_v21  ;;  %v1685_v31 = vld [vmem:[#allocation20_spill] sm:$0xff] }
  0x51   :  { %482 = vmatpush.msrb.mxu1 %v1306_v63  ;;  %695 = vmatpush.msra.mxu0 %v1182_v15  ;;  %v1676_v15 = vld [vmem:[#allocation12_spill] sm:$0xff] }
  0x52   :  { %630 = vmatpush.msrb.mxu3 %v1363_v49  ;;  %529 = vmatpush.msrb.mxu2 %v1216_v27 }
  0x53   :  { %484 = vmatpush.msrb.mxu1 %v1325_v12  ;;  %698 = vmatpush.msra.mxu0 %v1186_v16  ;;  %v1678_v16 = vld [vmem:[#allocation13_spill] sm:$0xff] }
  0x54   :  { %636 = vmatpush.msrb.mxu3 %v1674_v50  ;;  %531 = vmatpush.msrb.mxu2 %v1247_v40 }
  0x55   :  { %486 = vmatpush.msrb.mxu1 %v1347_v36  ;;  %701 = vmatpush.msra.mxu0 %v1675_v14 }
  0x56   :  { %443 = vmatmul.f32.gmra.mxu0 %v1359_v47  ;;  %488 = vmatmul.f32.vlgmr.msrb.gmra.mxu1 %v1315_v2  ;;  %v1683_v2 = vld [vmem:[#allocation17_spill] sm:$0xff] }
  0x57   :  { %760 = vmatpush.msra.mxu1 %v1165_v3  ;;  %704 = vmatpush.msra.mxu0 %v1676_v15 }
  0x58   :  { %642 = vmatpush.msrb.mxu3 %v1677_v52  ;;  %533 = vmatpush.msrb.mxu2 %v1262_v46  ;;  %v1690_v52 = vld [vmem:[#allocation26_spill] sm:$0xff] }
  0x59   :  { %762 = vmatpush.msra.mxu1 %v1167_v4  ;;  %707 = vmatpush.msra.mxu0 %v1678_v16 }
  0x5a   :  { %648 = vmatpush.msrb.mxu3 %v1679_v57  ;;  %535 = vmatpush.msrb.mxu2 %v1275_v51 }
  0x5b   :  { %764 = vmatpush.msra.mxu1 %v1169_v5  ;;  %710 = vmatpush.msra.mxu0 %v1680_v59 }
  0x5c   :  { %654 = vmatpush.msrb.mxu3 %v1424_v7  ;;  %537 = vmatpush.msrb.mxu2 %v1293_v58 }
  0x5d   :  { %766 = vmatpush.msra.mxu1 %v1171_v9  ;;  %713 = vmatpush.msra.mxu0 %v1681_v60 }
  0x5e   :  { %447 = vmatmul.f32.gmra.mxu0 %v1420_v19  ;;  %492 = vmatmul.f32.gmra.mxu1 %v1359_v47  ;;  %v1687_v47 = vld [vmem:[#allocation23_spill] sm:$0xff] }
  0x5f   :  { %768 = vmatpush.msra.mxu1 %v1173_v10  ;;  %716 = vmatpush.msra.mxu0 %v1682_v1 }
  0x60   :  { %660 = vmatpush.msrb.mxu3 %v1432_v62  ;;  %539 = vmatpush.msrb.mxu2 %v1306_v63 }
  0x61   :  { %770 = vmatpush.msra.mxu1 %v1175_v11  ;;  %719 = vmatpush.msra.mxu0 %v1683_v2 }
  0x62   :  { %666 = vmatpush.msrb.mxu3 %v1442_v43  ;;  %541 = vmatpush.msrb.mxu2 %v1325_v12  ;;  %v1686_v43 = vld [vmem:[#allocation21_spill] sm:$0xff] }
  0x63   :  { %772 = vmatpush.msra.mxu1 %v1188_v17  ;;  %722 = vmatpush.msra.mxu0 %v1684_v6 }
  0x64   :  { %672 = vmatpush.msrb.mxu3 %v1450_v20  ;;  %543 = vmatpush.msrb.mxu2 %v1347_v36 }
  0x65   :  { %774 = vmatpush.msra.mxu1 %v1196_v21  ;;  %725 = vmatpush.msra.mxu0 %v1685_v31 }
  0x66   :  { %451 = vmatmul.f32.gmra.mxu0 %v1454_v56  ;;  %496 = vmatmul.f32.gmra.mxu1 %v1420_v19 }
  0x67   :  { %776 = vmatpush.msra.mxu1 %v1216_v27  ;;  %728 = vmatpush.msra.mxu0 %v1686_v43 }
  0x68   :  { %898 = vmatpush.msra.mxu3 %v1165_v3  ;;  %819 = vmatpush.msra.mxu2 %v1204_v23 }
  0x69   :  { %778 = vmatpush.msra.mxu1 %v1247_v40  ;;  %731 = vmatpush.msra.mxu0 %v1687_v47 }
  0x6a   :  { %900 = vmatpush.msra.mxu3 %v1167_v4  ;;  %823 = vmatpush.msra.mxu2 %v1207_v24 }
  0x6b   :  { %780 = vmatpush.msra.mxu1 %v1262_v46  ;;  %734 = vmatpush.msra.mxu0 %v1371_v61 }
  0x6c   :  { %902 = vmatpush.msra.mxu3 %v1169_v5  ;;  %827 = vmatpush.msra.mxu2 %v1210_v25 }
  0x6d   :  { %782 = vmatpush.msra.mxu1 %v1275_v51  ;;  %737 = vmatpush.msra.mxu0 %v1385_v35 }
  0x6e   :  { %500 = vmatmul.f32.gmra.mxu1 %v1454_v56  ;;  %904 = vmatpush.msra.mxu3 %v1171_v9 }
  0x6f   :  { %784 = vmatpush.msra.mxu1 %v1293_v58  ;;  %831 = vmatpush.msra.mxu2 %v1214_v26 }
  0x70   :  { %906 = vmatpush.msra.mxu3 %v1173_v10 }
  0x71   :  { %786 = vmatpush.msra.mxu1 %v1306_v63  ;;  %835 = vmatpush.msra.mxu2 %v1230_v33 }
  0x72   :  { %908 = vmatpush.msra.mxu3 %v1175_v11 }
  0x73   :  { %788 = vmatpush.msra.mxu1 %v1325_v12  ;;  %839 = vmatpush.msra.mxu2 %v1234_v34 }
  0x74   :  { %910 = vmatpush.msra.mxu3 %v1188_v17 }
  0x75   :  { %790 = vmatpush.msra.mxu1 %v1347_v36  ;;  %843 = vmatpush.msra.mxu2 %v1251_v41 }
  0x76   :  { %912 = vmatpush.msra.mxu3 %v1196_v21 }
  0x77   :  { %847 = vmatpush.msra.mxu2 %v1269_v48 }
  0x78   :  { %914 = vmatpush.msra.mxu3 %v1216_v27 }
  0x79   :  { %851 = vmatpush.msra.mxu2 %v1285_v54 }
  0x7a   :  { %916 = vmatpush.msra.mxu3 %v1247_v40 }
  0x7b   :  { %855 = vmatpush.msra.mxu2 %v1309_v0 }
  0x7c   :  { %918 = vmatpush.msra.mxu3 %v1262_v46  ;;  %v1688_v46 = vld [vmem:[#allocation18_spill] sm:$0xff] }
  0x7d   :  { %859 = vmatpush.msra.mxu2 %v1328_v13 }
  0x7e   :  { %920 = vmatpush.msra.mxu3 %v1275_v51 }
  0x7f   :  { %863 = vmatpush.msra.mxu2 %v1350_v39 }
  0x80   :  { %922 = vmatpush.msra.mxu3 %v1293_v58 }
  0x81   :  { %867 = vmatpush.msra.mxu2 %v1368_v55 }
  0x82   :  { %924 = vmatpush.msra.mxu3 %v1306_v63 }
  0x83   :  { %871 = vmatpush.msra.mxu2 %v1382_v42 }
  0x84   :  { %926 = vmatpush.msra.mxu3 %v1325_v12 }
  0x85   :  { %875 = vmatpush.msra.mxu2 %v1401_v28 }
  0x86   :  { %928 = vmatpush.msra.mxu3 %v1347_v36 }
  0x87   :  { %879 = vmatpush.msra.mxu2 %v1414_v22 }
  0xab   :  { %v108_v3 = vpop.f32.mrf.mxu0 }
  0xb3   :  { %v116_v4 = vpop.f32.mrf.mxu0  ;;  %v233_v5 = vpop.f32.mrf.mxu1 }
  0xb4   :  { %v234_v23 = vadd.f32 %v233_v5, %v108_v3 }
  0xb5   :  { %v299_v11 = vpop.f32.mrf.mxu2  ;;  %v353_v21 = vpop.f32.mrf.mxu3 }
  0xb6   :  { %v300_v26 = vadd.f32 %v299_v11, %v234_v23 }
  0xb8   :  { %v354_v33 = vadd.f32 %v353_v21, %v300_v26 }
  0xbb   :  { %v124_v9 = vpop.f32.mrf.mxu0  ;;  %v237_v10 = vpop.f32.mrf.mxu1 }
  0xbc   :  { %v238_v28 = vadd.f32 %v237_v10, %v116_v4 }
  0xbd   :  { %v304_v27 = vpop.f32.mrf.mxu2  ;;  %v359_v34 = vpop.f32.mrf.mxu3 }
  0xbe   :  { %v305_v41 = vadd.f32 %v304_v27, %v238_v28 }
  0xc0   :  { %v360_v54 = vadd.f32 %v359_v34, %v305_v41 }
  0xc3   :  { %v132_v17 = vpop.f32.mrf.mxu0  ;;  %v241_v19 = vpop.f32.mrf.mxu1 }
  0xc4   :  { %v242_v58 = vadd.f32 %v241_v19, %v124_v9 }
  0xc5   :  { %v309_v51 = vpop.f32.mrf.mxu2  ;;  %v365_v13 = vpop.f32.mrf.mxu3 }
  0xc6   :  { %v310_v39 = vadd.f32 %v309_v51, %v242_v58 }
  0xc8   :  { %v366_v8 = vadd.f32 %v365_v13, %v310_v39 }
  0xcb   :  { %v245_v24 = vpop.f32.mrf.mxu1  ;;  %v440_v25 = vpop.f32.mrf.mxu0 }
  0xcc   :  { %v441_v35 = vadd.f32 %v440_v25, %v354_v33  ;;  %v246_v20 = vadd.f32 %v245_v24, %v132_v17 }
  0xcd   :  { %v314_v18 = vpop.f32.mrf.mxu2  ;;  %v371_v15 = vpop.f32.mrf.mxu3 }
  0xce   :  { %v315_v44 = vadd.f32 %v314_v18, %v246_v20 }
  0xd0   :  { %v372_v60 = vadd.f32 %v371_v15, %v315_v44 }
  0xd3   :  { %v444_v40 = vpop.f32.mrf.mxu0  ;;  %v489_v22 = vpop.f32.mrf.mxu1 }
  0xd4   :  { %v490_v42 = vadd.f32 %v489_v22, %v441_v35  ;;  %v445_v0 = vadd.f32 %v444_v40, %v360_v54 }
  0xd6   :  { %v1600_v48 = vsub.f32 %v1688_v46, %v490_v42 }
  0xd8   :  { %v508_v63 = vmul.f32 %v1600_v48, %v1600_v48 }
  0xda   :  { %v544_v12 = vand.u32 4294901760, %v508_v63 }
  0xdb   :  { %v493_v36 = vpop.f32.mrf.mxu1  ;;  %v448_v61 = vpop.f32.mrf.mxu0 }
  0xdc   :  { %v545_v49 = vsub.f32 %v508_v63, %v544_v12  ;;  %v494_v55 = vadd.f32 %v493_v36, %v445_v0  ;;  %674 = vmatmul.f32.vlgmr.msrb.gmra.mxu3 %v544_v12  ;;  %v449_v29 = vadd.f32 %v448_v61, %v366_v8 }
  0xde   :  { %v1605_v7 = vsub.f32 %v1689_v32, %v494_v55  ;;  %740 = vmatmul.f32.vlgmr.msra.gmra.mxu0 %v545_v49  ;;  %v546_v62 = vand.u32 4294901760, %v545_v49 }
  0xe0   :  { %v509_v53 = vmul.f32 %v1605_v7, %v1605_v7  ;;  %794 = vmatmul.f32.vlgmr.msra.gmra.mxu1 %v546_v62  ;;  %v547_v56 = vsub.f32 %v545_v49, %v546_v62 }
  0xe2   :  { %v552_v37 = vand.u32 4294901760, %v509_v53  ;;  %v548_v45 = vand.u32 4294901760, %v547_v56 }
  0xe3   :  { %v497_v38 = vpop.f32.mrf.mxu1  ;;  %v452_v59 = vpop.f32.mrf.mxu0 }
  0xe4   :  { %v498_v50 = vadd.f32 %v497_v38, %v449_v29  ;;  %549 = vmatmul.f32.vlgmr.msrb.gmra.mxu2 %v548_v45  ;;  %678 = vmatmul.f32.gmra.mxu3 %v552_v37  ;;  %v553_v14 = vsub.f32 %v509_v53, %v552_v37  ;;  %v453_v6 = vadd.f32 %v452_v59, %v372_v60 }
  0xe6   :  { %v1610_v16 = vsub.f32 %v1690_v52, %v498_v50  ;;  %745 = vmatmul.f32.gmra.mxu0 %v553_v14  ;;  %v554_v57 = vand.u32 4294901760, %v553_v14 }
  0xe8   :  { %v510_v1 = vmul.f32 %v1610_v16, %v1610_v16  ;;  %800 = vmatmul.f32.gmra.mxu1 %v554_v57  ;;  %v555_v2 = vsub.f32 %v553_v14, %v554_v57 }
  0xea   :  { %v560_v31 = vand.u32 4294901760, %v510_v1  ;;  %v556_v43 = vand.u32 4294901760, %v555_v2 }
  0xeb   :  { %v501_v47 = vpop.f32.mrf.mxu1 }
  0xec   :  { %v502_v3 = vadd.f32 %v501_v47, %v453_v6  ;;  %557 = vmatmul.f32.gmra.mxu2 %v556_v43  ;;  %682 = vmatmul.f32.gmra.mxu3 %v560_v31  ;;  %v561_v4 = vsub.f32 %v510_v1, %v560_v31 }
  0xee   :  { %v1615_v5 = vsub.f32 %v1444_v30, %v502_v3  ;;  %750 = vmatmul.f32.gmra.mxu0 %v561_v4  ;;  %v562_v9 = vand.u32 4294901760, %v561_v4 }
  0xf0   :  { %v511_v10 = vmul.f32 %v1615_v5, %v1615_v5  ;;  %806 = vmatmul.f32.gmra.mxu1 %v562_v9  ;;  %v563_v11 = vsub.f32 %v561_v4, %v562_v9  ;;  %v1035_v4 = vld [vmem:[%s1637_s2] ss:$0 sm:$0xff]  ;;  %s1127_s2 = smov [#allocation7]  }
  0xf2   :  { %v568_v17 = vand.u32 4294901760, %v511_v10  ;;  %v564_v19 = vand.u32 4294901760, %v563_v11 }
  0xf4   :  { %565 = vmatmul.f32.gmra.mxu2 %v564_v19  ;;  %686 = vmatmul.f32.gmra.mxu3 %v568_v17  ;;  %v569_v21 = vsub.f32 %v511_v10, %v568_v17 }
  0xf6   :  { %755 = vmatmul.f32.gmra.mxu0 %v569_v21  ;;  %v570_v23 = vand.u32 4294901760, %v569_v21 }
  0xf8   :  { %812 = vmatmul.f32.gmra.mxu1 %v570_v23  ;;  %v571_v24 = vsub.f32 %v569_v21, %v570_v23  ;;  %v1036_v21 = vld [vmem:[%s1638_s3] ss:$0 sm:$0xff]  ;;  %s1014_s3 = sshll.u32 %s1127_s2, 4  ;;  %s1015_s3 = int_to_ptr.vmem [resolvable:$true] %s1014_s3 }
  0xfa   :  { %v572_v25 = vand.u32 4294901760, %v571_v24 }
  0xfc   :  { %573 = vmatmul.f32.gmra.mxu2 %v572_v25  ;;  %930 = vmatmul.f32.vlgmr.msra.gmra.mxu3 %v544_v12 }
 0x104   :  { %881 = vmatmul.f32.vlgmr.msra.gmra.mxu2 %v544_v12  ;;  %934 = vmatmul.f32.gmra.mxu3 %v552_v37 }
 0x10c   :  { %885 = vmatmul.f32.gmra.mxu2 %v552_v37  ;;  %938 = vmatmul.f32.gmra.mxu3 %v560_v31 }
 0x114   :  { %889 = vmatmul.f32.gmra.mxu2 %v560_v31  ;;  %942 = vmatmul.f32.gmra.mxu3 %v568_v17 }
 0x11c   :  { %893 = vmatmul.f32.gmra.mxu2 %v568_v17 }
 0x15b   :  { %v741_v22 = vpop.f32.mrf.mxu0 }
 0x15d   :  { %v795_v42 = vpop.f32.mrf.mxu1 }
 0x15f   :  { %v675_v30 = vpop.f32.mrf.mxu3 }
 0x163   :  { %v746_v63 = vpop.f32.mrf.mxu0 }
 0x165   :  { %v801_v39 = vpop.f32.mrf.mxu1 }
 0x167   :  { %v550_v26 = vpop.f32.mrf.mxu2  ;;  %v679_v27 = vpop.f32.mrf.mxu3 }
 0x168   :  { %v551_v40 = vadd.f32 1e-05, %v550_v26 }
 0x16a   :  { %v676_v41 = vadd.f32 %v675_v30, %v551_v40 }
 0x16b   :  { %v751_v20 = vpop.f32.mrf.mxu0 }
 0x16c   :  { %v742_v54 = vadd.f32 %v741_v22, %v676_v41 }
 0x16d   :  { %v807_v38 = vpop.f32.mrf.mxu1 }
 0x16e   :  { %v796_v12 = vadd.f32 %v795_v42, %v742_v54 }
 0x16f   :  { %v558_v33 = vpop.f32.mrf.mxu2  ;;  %v683_v28 = vpop.f32.mrf.mxu3 }
 0x170   :  { %v559_v51 = vadd.f32 1e-05, %v558_v33 }
 0x172   :  { %v680_v0 = vadd.f32 %v679_v27, %v559_v51 }
 0x173   :  { %v756_v1 = vpop.f32.mrf.mxu0 }
 0x174   :  { %v747_v61 = vadd.f32 %v746_v63, %v680_v0 }
 0x175   :  { %v813_v9 = vpop.f32.mrf.mxu1 }
 0x176   :  { %v802_v8 = vadd.f32 %v801_v39, %v747_v61 }
 0x177   :  { %v566_v34 = vpop.f32.mrf.mxu2  ;;  %v687_v35 = vpop.f32.mrf.mxu3 }
 0x178   :  { %v567_v49 = vadd.f32 1e-05, %v566_v34 }
 0x17a   :  { %v684_v62 = vadd.f32 %v683_v28, %v567_v49 }
 0x17c   :  { %v752_v45 = vadd.f32 %v751_v20, %v684_v62 }
 0x17e   :  { %v808_v15 = vadd.f32 %v807_v38, %v752_v45 }
 0x17f   :  { %v574_v46 = vpop.f32.mrf.mxu2  ;;  %v931_v58 = vpop.f32.mrf.mxu3 }
 0x180   :  { %v575_v29 = vadd.f32 1e-05, %v574_v46 }
 0x182   :  { %v688_v14 = vadd.f32 %v687_v35, %v575_v29 }
 0x184   :  { %v757_v43 = vadd.f32 %v756_v1, %v688_v14 }
 0x186   :  { %v814_v19 = vadd.f32 %v813_v9, %v757_v43 }
 0x187   :  { %v882_v13 = vpop.f32.mrf.mxu2  ;;  %v935_v32 = vpop.f32.mrf.mxu3 }
 0x188   :  { %v883_v36 = vadd.f32 %v882_v13, %v796_v12 }
 0x18a   :  { %v932_v55 = vadd.f32 %v931_v58, %v883_v36 }
 0x18c   :  { %1037 = vrsqrt.f32 %v932_v55  ;;  %vm952_vm1 = vweird.f32 %v932_v55 }
 0x18f   :  { %v886_v53 = vpop.f32.mrf.mxu2  ;;  %v939_v57 = vpop.f32.mrf.mxu3 }
 0x190   :  { %v887_v56 = vadd.f32 %v886_v53, %v802_v8 }
 0x192   :  { %v1038_v18 = vpop.eup %1037  ;;  %v936_v37 = vadd.f32 %v935_v32, %v887_v56 }
 0x193   :  { %v947_v44 = vmul.f32 %v1038_v18, %v932_v55  ;;  %vm953_vm0 = vweird.f32 %v1038_v18 }
 0x194   :  { %1039 = vrsqrt.f32 %v936_v37  ;;  %vm954_vm2 = vmor %vm952_vm1, %vm953_vm0  ;;  %vm962_vm4 = vweird.f32 %v936_v37 }
 0x195   :  { %v948_v50 = vmul.f32 %v1038_v18, %v947_v44 }
 0x197   :  { %v949_v52 = vmul.f32 0.5, %v948_v50  ;;  %v890_v59 = vpop.f32.mrf.mxu2  ;;  %v943_v27 = vpop.f32.mrf.mxu3 }
 0x198   :  { %v891_v60 = vadd.f32 %v890_v59, %v808_v15 }
 0x199   :  { %v950_v2 = vsub.f32 1.5, %v949_v52 }
 0x19a   :  { %v1040_v6 = vpop.eup %1039  ;;  %v940_v31 = vadd.f32 %v939_v57, %v891_v60 }
 0x19b   :  { %v951_v47 = vmul.f32 %v1038_v18, %v950_v2  ;;  %v957_v3 = vmul.f32 %v1040_v6, %v936_v37  ;;  %vm963_vm3 = vweird.f32 %v1040_v6 }
 0x19c   :  { %1041 = vrsqrt.f32 %v940_v31  ;;  %vm964_vm5 = vmor %vm962_vm4, %vm963_vm3  ;;  %vm972_vm7 = vweird.f32 %v940_v31 }
 0x19d   :  { %v955_v10 = vsel %vm954_vm2, %v1038_v18, %v951_v47  ;;  %v958_v11 = vmul.f32 %v1040_v6, %v957_v3 }
 0x19e   :  { %v986_v17 = vmul.f32 %v955_v10, %v1600_v48 }
 0x19f   :  { %v959_v23 = vmul.f32 0.5, %v958_v11  ;;  %v894_v24 = vpop.f32.mrf.mxu2 }
 0x1a0   :  { %v994_v25 = vmul.f32 %v1035_v4, %v986_v17  ;;  %v895_v30 = vadd.f32 %v894_v24, %v814_v19 }
 0x1a1   :  { %v960_v26 = vsub.f32 1.5, %v959_v23 }
 0x1a2   :  { %v1042_v33 = vpop.eup %1041  ;;  %v944_v28 = vadd.f32 %v943_v27, %v895_v30  ;;  %v1002_v34 = vadd.f32 %v1036_v21, %v994_v25 }
 0x1a3   :  { %v961_v35 = vmul.f32 %v1040_v6, %v960_v26  ;;  %v967_v40 = vmul.f32 %v1042_v33, %v940_v31  ;;  %vm973_vm6 = vweird.f32 %v1042_v33 }
 0x1a4   :  { %1043 = vrsqrt.f32 %v944_v28  ;;  %1006 = vst [vmem:[#allocation7] sm:$0xff] %v1002_v34  ;;  %vm974_vm8 = vmor %vm972_vm7, %vm973_vm6  ;;  %vm982_vm10 = vweird.f32 %v944_v28 }
 0x1a5   :  { %v965_v48 = vsel %vm964_vm5, %v1040_v6, %v961_v35  ;;  %v968_v22 = vmul.f32 %v1042_v33, %v967_v40 }
 0x1a6   :  { %v987_v41 = vmul.f32 %v965_v48, %v1605_v7 }
 0x1a7   :  { %v969_v42 = vmul.f32 0.5, %v968_v22 }
 0x1a8   :  { %v995_v46 = vmul.f32 %v1035_v4, %v987_v41 }
 0x1a9   :  { %v970_v51 = vsub.f32 1.5, %v969_v42 }
 0x1aa   :  { %v1044_v54 = vpop.eup %1043  ;;  %v1003_v58 = vadd.f32 %v1036_v21, %v995_v46 }
 0x1ab   :  { %v971_v63 = vmul.f32 %v1042_v33, %v970_v51  ;;  %v977_v0 = vmul.f32 %v1044_v54, %v944_v28  ;;  %vm983_vm9 = vweird.f32 %v1044_v54 }
 0x1ac   :  { %1007 = vst [vmem:[#allocation7 + $0x8] sm:$0xff] %v1003_v58  ;;  %vm984_vm11 = vmor %vm982_vm10, %vm983_vm9 }
 0x1ad   :  { %v975_v12 = vsel %vm974_vm8, %v1042_v33, %v971_v63  ;;  %v978_v13 = vmul.f32 %v1044_v54, %v977_v0 }
 0x1ae   :  { %v988_v36 = vmul.f32 %v975_v12, %v1610_v16 }
 0x1af   :  { %v979_v39 = vmul.f32 0.5, %v978_v13 }
 0x1b0   :  { %v996_v49 = vmul.f32 %v1035_v4, %v988_v36 }
 0x1b1   :  { %v980_v55 = vsub.f32 1.5, %v979_v39 }
 0x1b2   :  { %v1004_v7 = vadd.f32 %v1036_v21, %v996_v49 }
 0x1b3   :  { %v981_v61 = vmul.f32 %v1044_v54, %v980_v55 }
 0x1b4   :  { %1008 = vst [vmem:[#allocation7 + $0x10] sm:$0xff] %v1004_v7 }
 0x1b5   :  { %v985_v32 = vsel %vm984_vm11, %v1044_v54, %v981_v61 }
 0x1b6   :  { %v989_v62 = vmul.f32 %v985_v32, %v1615_v5 }
 0x1b8   :  { %v997_v8 = vmul.f32 %v1035_v4, %v989_v62 }
 0x1ba   :  { %v1005_v16 = vadd.f32 %v1036_v21, %v997_v8 }
 0x1bc   :  { %1009 = vst [vmem:[#allocation7 + $0x18] sm:$0xff] %v1005_v16 }
 0x1bd   :  { %1022 = dma.vmem_to_hbm [thread:$0]  %s1015_s3, 512, %s1017_s5, [#allocation4], %s1124_s23, %s1124_s23, %s1125_s24  }
 0x1be   :  { %1121 = dma.done.wait [#allocation4], 512  }
 0x1bf   :  { %1122 = vsyncadd [#allocation4], 4294966784 }
 0x1c0   :  { %1027 = vsyncpa [#allocation3], 1 }
 0x1c1   :  { %1028 = vsyncpa [#allocation6], 1 }
 0x1c2   :  { %1029 = vsyncpa [#allocation4], 1 }

</bundles_post_ra>
